<compile_context>
chip_gen: v6e
topology: v6e:2x2x1
jax: 0.10.0
libtpu: 0.0.40
codegen_flags: <defaults>
</compile_context>

<pallas_src>
import jax
import jax.numpy as jnp
from jax.experimental import pallas as pl
from jax.experimental.pallas import tpu as pltpu

EPS = 1e-5


# ------------------------- Pallas kernel (hot path) -------------------------
def _layernorm_kernel(x_ref, w_ref, b_ref, o_ref):
    # x_ref: (ROW_TILE, H) tile; w_ref/b_ref: (1, H) f32, broadcast over rows.
    x = x_ref[...].astype(jnp.float32)
    mean = jnp.mean(x, axis=-1, keepdims=True)
    centered = x - mean
    var = jnp.mean(centered * centered, axis=-1, keepdims=True)  # biased, like torch
    inv = jax.lax.rsqrt(var + EPS)
    y = centered * inv * w_ref[...] + b_ref[...]
    o_ref[...] = y.astype(o_ref.dtype)


def _physical_vmem_bytes():
    try:
        return int(pltpu.get_tpu_info().vmem_capacity_bytes)
    except Exception:
        return 64 * 1024 * 1024  # conservative fallback


def _choose_row_tile(n_rows, hidden, itemsize, vmem_budget_bytes):
    # Per pipelined row: 2 buffers x (input tile + output tile) in the I/O
    # dtype, plus ~4 full-tile f32 temporaries inside the kernel (upcast x,
    # centered, centered^2 / y, broadcasted products).
    per_row_bytes = 2 * 2 * hidden * itemsize + 4 * hidden * 4
    budget_rows = max(int(vmem_budget_bytes * 0.7) // per_row_bytes, 8)
    # Target ~4 MiB input blocks so the ~0.35 us per-step overhead is noise.
    target_rows = max((4 << 20) // (hidden * itemsize), 8)
    tile = min(budget_rows, target_rows)
    # Keep at least 2 grid steps when there is enough work so both v7x
    # TensorCores get a share of the "parallel" row axis.
    if n_rows >= 32:
        tile = min(tile, pl.cdiv(n_rows, 2))
    tile = min(tile, n_rows)
    tile = max((tile // 16) * 16, 8)  # multiple of 16 (bf16 packs 2 rows/sublane)
    return tile


def _ref_layernorm(x, weight, bias):
    mean = jnp.mean(x, axis=-1, keepdims=True)
    var = jnp.mean((x - mean) ** 2, axis=-1, keepdims=True)
    return (x - mean) / jnp.sqrt(var + EPS) * weight + bias


def pallas_layernorm(x, weight, bias, *, row_tile=None):
    """LayerNorm over the last dim of x (any leading dims), via a Pallas kernel."""
    orig_shape = x.shape
    H = orig_shape[-1]

    # H is always the full last dim of the block, so any H is *correct*; but
    # stores are only lane-dense when H is a multiple of 128.  For tiny H the
    # kernel would be badly lane-sparse, so fall back to XLA there.
    if H < 128:
        # TODO(synk): add a packed (row-folded) Pallas path for H < 128.
        return _ref_layernorm(x, weight.astype(jnp.float32), bias.astype(jnp.float32)).astype(x.dtype)

    x2 = x.reshape(-1, H)
    R = x2.shape[0]
    itemsize = jnp.dtype(x.dtype).itemsize

    # Assume per-TensorCore VMEM is 64 MiB (v7x) even if the query reports the
    # larger per-chip / older-generation 128 MiB figure; the ~4 MiB target
    # block makes the difference irrelevant on v5e/v6e anyway.
    vmem_budget = min(_physical_vmem_bytes(), 64 * 1024 * 1024)
    if row_tile is None:
        row_tile = _choose_row_tile(R, H, itemsize, vmem_budget)

    grid = (pl.cdiv(R, row_tile),)  # ragged last block handled by Pallas

    w2 = weight.reshape(1, H).astype(jnp.float32)
    b2 = bias.reshape(1, H).astype(jnp.float32)

    tile_io_bytes = row_tile * H * itemsize
    tile_f32_bytes = row_tile * H * 4
    working_set = 2 * 2 * tile_io_bytes + 4 * tile_f32_bytes + 2 * H * 4
    vmem_limit = min(vmem_budget, max(32 << 20, working_set + (4 << 20)))

    cost = pl.CostEstimate(
        flops=9 * R * H,
        transcendentals=R,  # one rsqrt per row
        bytes_accessed=2 * R * H * itemsize + 2 * H * 4,
    )

    out = pl.pallas_call(
        _layernorm_kernel,
        out_shape=jax.ShapeDtypeStruct((R, H), x.dtype),
        grid_spec=pltpu.PrefetchScalarGridSpec(
            num_scalar_prefetch=0,
            grid=grid,
            in_specs=[
                pl.BlockSpec((row_tile, H), lambda i: (i, 0)),
                pl.BlockSpec((1, H), lambda i: (0, 0)),
                pl.BlockSpec((1, H), lambda i: (0, 0)),
            ],
            out_specs=pl.BlockSpec((row_tile, H), lambda i: (i, 0)),
        ),
        compiler_params=pltpu.CompilerParams(
            dimension_semantics=("parallel",),  # row axis shards across TCs (v7x)
            vmem_limit_bytes=int(vmem_limit),
        ),
        cost_estimate=cost,
    )(x2, w2, b2)

    return out.reshape(orig_shape)


# --------------------- ExtractionWrapper semantics (glue) -------------------
class ModuleInvocation:
    def __init__(self, args, kwargs, output):
        self.args = args
        self.kwargs = kwargs
        self.output = output


class WrappedLayerNorm:
    """Stand-in for torch.nn.LayerNorm, compute delegated to the Pallas kernel."""

    def __init__(self, hidden, key):
        kw, kb = jax.random.split(key)
        # Deterministic synthetic params (not a checkpoint load).
        self.weight = 1.0 + 0.1 * jax.random.normal(kw, (hidden,), dtype=jnp.float32)
        self.bias = 0.05 * jax.random.normal(kb, (hidden,), dtype=jnp.float32)

    def __call__(self, x):
        return pallas_layernorm(x, self.weight, self.bias)


class ExtractionState:
    def __init__(self, name, torch_name, original_module):
        self.original_module = original_module
        self.accelerate_hook = None  # no accelerate in this synthetic setting
        self.invocations = []
        self.children = {}
        self.name = name
        self.torch_name = torch_name


class ExtractionWrapper:
    """Pass-through wrapper: runs (no-op) hooks, calls the wrapped module,
    records the invocation. Mirrors ExtractionWrapper.forward semantics."""

    def __init__(self, state: ExtractionState):
        self._graphpatch_extraction_state = state
        self._graphpatch_record_invocations = True
        self._graphpatch_accelerate_hook = state.accelerate_hook
        self._graphpatch_wrapped_module = state.original_module

    def maybe_accelerate_pre_hook(self, *args, **kwargs):
        if self._graphpatch_accelerate_hook is not None:
            # TODO(synk): accelerate CPU/disk offload hooks have no Pallas equivalent.
            pass
        return (args, kwargs)

    def maybe_accelerate_post_hook(self, output):
        return output

    def __call__(self, *args, **kwargs):
        args, kwargs = self.maybe_accelerate_pre_hook(*args, **kwargs)
        output = self.maybe_accelerate_post_hook(
            self._graphpatch_wrapped_module(*args, **kwargs)
        )
        if self._graphpatch_record_invocations:
            self._graphpatch_extraction_state.invocations.append(
                ModuleInvocation(args, kwargs, output)
            )
        return output


# ---------------------------------- main ------------------------------------
if __name__ == "__main__":
    key = jax.random.PRNGKey(0)
    k_x, k_p, k_x2 = jax.random.split(key, 3)

    # hidden = 128 keeps the output lane-dense (unmasked vector stores).
    batch, seq, hidden = 2, 8, 128
    x = jax.random.normal(k_x, (batch, seq, hidden), dtype=jnp.float32)

    wrapped = WrappedLayerNorm(hidden, k_p)
    state = ExtractionState(name="ln", torch_name="ln", original_module=wrapped)
    wrapper = ExtractionWrapper(state)

    out = wrapper(x)
    out = jax.block_until_ready(out)

    ref = _ref_layernorm(x, wrapped.weight, wrapped.bias)
    assert out.shape == x.shape and out.dtype == x.dtype
    assert jnp.max(jnp.abs(out - ref)) < 1e-4
    assert len(state.invocations) == 1  # forward records its invocation

    # Exercise the ragged-grid path (rows not divisible by the tile, no host
    # padding): 3*5 = 15 rows -> tile 8, grid of 2 steps, last block ragged.
    x_ragged = jax.random.normal(k_x2, (3, 5, hidden), dtype=jnp.float32)
    out_ragged = jax.block_until_ready(
        pallas_layernorm(x_ragged, wrapped.weight, wrapped.bias)
    )
    ref_ragged = _ref_layernorm(x_ragged, wrapped.weight, wrapped.bias)
    assert out_ragged.shape == x_ragged.shape
    assert jnp.max(jnp.abs(out_ragged - ref_ragged)) < 1e-4

    # Offset-mean input: two-pass variance must stay accurate (no cancellation).
    x_off = 100.0 + jax.random.normal(k_x, (batch, seq, hidden), dtype=jnp.float32)
    out_off = jax.block_until_ready(
        pallas_layernorm(x_off, wrapped.weight, wrapped.bias)
    )
    ref_off = _ref_layernorm(x_off, wrapped.weight, wrapped.bias)
    assert jnp.max(jnp.abs(out_off - ref_off)) < 1e-3

    print("KERNEL_OK")
</pallas_src>

<mosaic_0001>
module attributes {stable_mosaic.version = 11 : i64} {
  func.func @_layernorm_kernel(%arg0: i32, %arg1: memref<16x128xf32, #tpu.memory_space<vmem>>, %arg2: memref<1x128xf32, #tpu.memory_space<vmem>>, %arg3: memref<1x128xf32, #tpu.memory_space<vmem>>, %arg4: memref<16x128xf32, #tpu.memory_space<vmem>>) attributes {dimension_semantics = [#tpu.dimension_semantics<parallel>], iteration_bounds = array<i64: 1>, scalar_prefetch = 0 : i64, scratch_operands = 0 : i64, tpu.core_type = #tpu.core_type<tc>, window_params = [{transform_indices = @transform_0, window_bounds = array<i64: 16, 128>}, {pipeline_mode = #tpu.pipeline_mode<synchronous>, transform_indices = @transform_1, window_bounds = array<i64: 1, 128>}, {pipeline_mode = #tpu.pipeline_mode<synchronous>, transform_indices = @transform_2, window_bounds = array<i64: 1, 128>}, {transform_indices = @transform_3, window_bounds = array<i64: 16, 128>}]} {
    %c0 = arith.constant 0 : index
    %c0_0 = arith.constant 0 : index
    %0 = vector.load %arg1[%c0, %c0_0] : memref<16x128xf32, #tpu.memory_space<vmem>>, vector<16x128xf32>
    %cst = arith.constant dense<0.000000e+00> : vector<16xf32>
    %1 = vector.multi_reduction <add>, %0, %cst [1] : vector<16x128xf32> to vector<16xf32>
    %2 = vector.shape_cast %1 : vector<16xf32> to vector<16x1xf32>
    %cst_1 = arith.constant 1.280000e+02 : f32
    %3 = vector.broadcast %cst_1 : f32 to vector<16x1xf32>
    %4 = arith.divf %2, %3 : vector<16x1xf32>
    %5 = vector.broadcast %4 : vector<16x1xf32> to vector<16x128xf32>
    %6 = arith.subf %0, %5 : vector<16x128xf32>
    %7 = arith.mulf %6, %6 : vector<16x128xf32>
    %cst_2 = arith.constant dense<0.000000e+00> : vector<16xf32>
    %8 = vector.multi_reduction <add>, %7, %cst_2 [1] : vector<16x128xf32> to vector<16xf32>
    %9 = vector.shape_cast %8 : vector<16xf32> to vector<16x1xf32>
    %cst_3 = arith.constant 1.280000e+02 : f32
    %10 = vector.broadcast %cst_3 : f32 to vector<16x1xf32>
    %11 = arith.divf %9, %10 : vector<16x1xf32>
    %cst_4 = arith.constant 9.99999974E-6 : f32
    %12 = vector.broadcast %cst_4 : f32 to vector<16x1xf32>
    %13 = arith.addf %11, %12 : vector<16x1xf32>
    %14 = math.rsqrt %13 : vector<16x1xf32>
    %15 = vector.broadcast %14 : vector<16x1xf32> to vector<16x128xf32>
    %16 = arith.mulf %6, %15 : vector<16x128xf32>
    %c0_5 = arith.constant 0 : index
    %c0_6 = arith.constant 0 : index
    %17 = vector.load %arg2[%c0_5, %c0_6] : memref<1x128xf32, #tpu.memory_space<vmem>>, vector<1x128xf32>
    %18 = vector.broadcast %17 : vector<1x128xf32> to vector<16x128xf32>
    %19 = arith.mulf %16, %18 : vector<16x128xf32>
    %c0_7 = arith.constant 0 : index
    %c0_8 = arith.constant 0 : index
    %20 = vector.load %arg3[%c0_7, %c0_8] : memref<1x128xf32, #tpu.memory_space<vmem>>, vector<1x128xf32>
    %21 = vector.broadcast %20 : vector<1x128xf32> to vector<16x128xf32>
    %22 = arith.addf %19, %21 : vector<16x128xf32>
    %c0_9 = arith.constant 0 : index
    %c0_10 = arith.constant 0 : index
    %23 = vector.load %arg4[%c0_9, %c0_10] : memref<16x128xf32, #tpu.memory_space<vmem>>, vector<16x128xf32>
    tpu.vector_store %arg4[%c0_9, %c0_10], %22 {strides = array<i32>} : memref<16x128xf32, #tpu.memory_space<vmem>>, vector<16x128xf32>,
    return
  }
  func.func @transform_0(%arg0: i32) -> (i32, i32) {
    %c0_i32 = arith.constant 0 : i32
    %c0_i32_0 = arith.constant 0 : i32
    return %arg0, %c0_i32 : i32, i32
  }
  func.func @transform_1(%arg0: i32) -> (i32, i32) {
    %c0_i32 = arith.constant 0 : i32
    %c0_i32_0 = arith.constant 0 : i32
    %c0_i32_1 = arith.constant 0 : i32
    return %c0_i32, %c0_i32_0 : i32, i32
  }
  func.func @transform_2(%arg0: i32) -> (i32, i32) {
    %c0_i32 = arith.constant 0 : i32
    %c0_i32_0 = arith.constant 0 : i32
    %c0_i32_1 = arith.constant 0 : i32
    return %c0_i32, %c0_i32_0 : i32, i32
  }
  func.func @transform_3(%arg0: i32) -> (i32, i32) {
    %c0_i32 = arith.constant 0 : i32
    %c0_i32_0 = arith.constant 0 : i32
    return %arg0, %c0_i32 : i32, i32
  }
}

</mosaic_0001>

<bundles_post_ra>
// kernel: tpu_custom_call.1
= control target key start
LH: loop header
LB: loop body
LE: loop exit
PB: predicated region body
PF: predicated region fallthrough
CT: control target
= control target key end

     0   :  { %8 = vsyncpa [#allocation3], 0  ;;  %s187_s0 = inlined_call_operand.hbm [shape: f32[16,128], index: 0, kind: input, shape index: {}]   ;;  %s188_s1 = inlined_call_operand.vmem [shape: f32[1,128], index: 1, kind: input, shape index: {}]   ;;  %s189_s2 = inlined_call_operand.vmem [shape: f32[1,128], index: 2, kind: input, shape index: {}]   ;;  %s190_s3 = inlined_call_operand.hbm [shape: f32[16,128], index: 3, kind: output, shape index: {}]  }
   0x1   :  { %9 = vsyncpa [#allocation4], 0  ;;  %s145_s12 = smov [#allocation2]  }
   0x2   :  { %s15_s13 = sshll.u32 %s145_s12, 4  ;;  %s16_s13 = int_to_ptr.vmem [resolvable:$true] %s15_s13 }
   0x3   :  { %s109_s14 = scalar_lea.vmem %s16_s13, 256  ;;  %p114_p1 = scmp.lt.s32.totalorder %s16_s13, %s16_s13 }
   0x4   :  { %p110_p0 = scmp.ne.s32.totalorder %s16_s13, %s109_s14  ;;  %p115_p2 = scmp.lt.s32.totalorder %s109_s14, %s109_s14 }
   0x6   :  { %p116_p3 = por %p115_p2, %p114_p1 }
   0x8   :  { %p117_p4 = pnand %p116_p3, %p110_p0 }
   0xa   :  { %120 = shalt.err (!%p117_p4)
}
   0xb   :  { %s146_s15 = smov 128   ;;  %s147_s16 = smov 8  }
   0xc   :  { %21 = dma.hbm_to_vmem [thread:$0]  %s187_s0, 256, %s16_s13, [#allocation3], %s146_s15, %s146_s15, %s147_s16  }
   0xd   :  { %141 = dma.done.wait [#allocation3], 256  }
   0xe   :  { %142 = vsyncadd [#allocation3], 4294967040  ;;  %v29_v0 = vld [vmem:[#allocation2] sm:$0xff]  ;;  %v30_v1 = vld [vmem:[#allocation2 + $0x8] sm:$0xff]  ;;  %s148_s22 = smov [#allocation5]  }
   0xf   :  { %31 = vadd.xlane.f32.xlu0 %v29_v0  ;;  %v91_v17 = vld [vmem:[%s188_s1] ss:$0 sm:$0xff]  ;;  %s79_s23 = sshll.u32 %s148_s22, 4  ;;  %s80_s23 = int_to_ptr.vmem [resolvable:$true] %s79_s23 }
  0x10   :  { %v92_v19 = vld [vmem:[%s189_s2] ss:$0 sm:$0xff]  ;;  %s121_s24 = scalar_lea.vmem %s80_s23, 256  ;;  %p126_p6 = scmp.lt.s32.totalorder %s80_s23, %s80_s23 }
  0x11   :  { %p122_p5 = scmp.ne.s32.totalorder %s80_s23, %s121_s24  ;;  %p127_p7 = scmp.lt.s32.totalorder %s121_s24, %s121_s24 }
  0x13   :  { %33 = vadd.xlane.f32.xlu0 %v30_v1  ;;  %p128_p8 = por %p127_p7, %p126_p6 }
  0x15   :  { %p129_p9 = pnand %p128_p8, %p122_p5 }
  0x98   :  { %v32_v2 = vpop.xlane.xlu0 %31 }
  0x99   :  { %v36_v3 = vmul.f32 0.0078125, %v32_v2 }
  0x9b   :  { %v38_v4 = vsub.f32 %v29_v0, %v36_v3 }
  0x9c   :  { %v34_v5 = vpop.xlane.xlu0 %33 }
  0x9d   :  { %v37_v6 = vmul.f32 0.0078125, %v34_v5  ;;  %v40_v7 = vmul.f32 %v38_v4, %v38_v4 }
  0x9f   :  { %v39_v8 = vsub.f32 %v30_v1, %v37_v6  ;;  %42 = vadd.xlane.f32.xlu1 %v40_v7 }
  0xa1   :  { %v41_v9 = vmul.f32 %v39_v8, %v39_v8 }
  0xa3   :  { %44 = vadd.xlane.f32.xlu1 %v41_v9 }
 0x128   :  { %v43_v10 = vpop.xlane.xlu1 %42 }
 0x129   :  { %v46_v11 = vmul.f32 0.0078125, %v43_v10 }
 0x12b   :  { %v48_v12 = vadd.f32 1e-05, %v46_v11 }
 0x12c   :  { %v45_v13 = vpop.xlane.xlu1 %44 }
 0x12d   :  { %97 = vrsqrt.f32 %v48_v12  ;;  %v47_v14 = vmul.f32 0.0078125, %v45_v13 }
 0x12f   :  { %v49_v15 = vadd.f32 1e-05, %v47_v14 }
 0x131   :  { %99 = vrsqrt.f32 %v49_v15 }
 0x13a   :  { %v98_v16 = vpop.eup %97 }
 0x13b   :  { %v52_v18 = vmul.f32 %v98_v16, %v38_v4 }
 0x13d   :  { %v61_v20 = vmul.f32 %v91_v17, %v52_v18 }
 0x13e   :  { %v100_v21 = vpop.eup %99 }
 0x13f   :  { %v53_v22 = vmul.f32 %v100_v21, %v39_v8  ;;  %v70_v23 = vadd.f32 %v92_v19, %v61_v20 }
 0x141   :  { %v62_v24 = vmul.f32 %v91_v17, %v53_v22  ;;  %72 = vst [vmem:[#allocation5] sm:$0xff] %v70_v23 }
 0x143   :  { %v71_v25 = vadd.f32 %v92_v19, %v62_v24 }
 0x145   :  { %73 = vst [vmem:[#allocation5 + $0x8] sm:$0xff] %v71_v25 }
 0x146   :  { %132 = shalt.err (!%p129_p9)
}
 0x147   :  { %85 = dma.vmem_to_hbm [thread:$0]  %s80_s23, 256, %s190_s3, [#allocation4], %s146_s15, %s146_s15, %s147_s16  }
 0x148   :  { %143 = dma.done.wait [#allocation4], 256  }
 0x149   :  { %144 = vsyncadd [#allocation4], 4294967040 }
 0x14a   :  { %89 = vsyncpa [#allocation3], 1 }
 0x14b   :  { %90 = vsyncpa [#allocation4], 1 }

</bundles_post_ra>
